<compile_context>
chip_gen: v7x
topology: tpu7x:2x2x1
jax: 0.10.0
libtpu: 0.0.40
codegen_flags: <defaults>
</compile_context>

<pallas_src>
import jax
import jax.numpy as jnp
from jax.experimental import pallas as pl
from jax.experimental.pallas import tpu as pltpu


def _encoder_kernel(x_ref, w_ref, b_ref, o_ref):
    # x_ref: (TQ, Kp)   packed input rows            (Kp = PACK*C)
    # w_ref: (Kp, Np)   block-diagonal packed weight (Np = PACK*E, lane-dense)
    # b_ref: (1,  Np)   packed bias
    # o_ref: (TQ, Np)   lane-dense output rows
    y = jnp.dot(x_ref[...], w_ref[...], preferred_element_type=jnp.float32)
    o_ref[...] = jnp.maximum(y + b_ref[...], 0.0).astype(o_ref.dtype)


def cnn_encoder_forward(
    inputs_nchw,
    w,
    b,
    *,
    vmem_budget_bytes=24 * 1024 * 1024,   # double-buffered in+out blocks
    max_tile_rows=32768,
    single_tile_rows=4096,
):
    """relu(inputs.permute(0,2,3,1).view(B, H*W, C) @ w + b) -> (B, H*W, E).

    inputs_nchw: (B, C, H, W) with C == input_dim
    w: (input_dim, embedding_dim)   (transposed vs. torch's (E, C) storage)
    b: (embedding_dim,)
    """
    B, C, H, W = inputs_nchw.shape
    Cw, E = w.shape
    assert C == Cw
    HW = H * W
    rows = B * HW
    dtype = inputs_nchw.dtype

    # Lane-pack factor: fold PACK consecutive output rows into one 128-lane row.
    if E < 128 and 128 % E == 0 and rows % (128 // E) == 0:
        pack = 128 // E
    else:
        pack = 1            # already lane-dense (E >= 128) or not packable

    k_packed = pack * C
    n_packed = pack * E
    q_rows = rows // pack

    # NHWC + row-major flatten; (rows, C) -> (q_rows, pack*C) is a free row-major
    # regroup.  The linear op is independent per row, so grouping rows (even
    # across batch boundaries) is purely a layout choice.
    x_rows = jnp.transpose(inputs_nchw, (0, 2, 3, 1)).reshape(q_rows, k_packed)

    if pack > 1:
        # W_p[s*C + c, s'*E + e] = W[c, e] * (s == s')   (block diagonal)
        w_p = jnp.kron(jnp.eye(pack, dtype=w.dtype), w)
        b_p = jnp.tile(b, pack).reshape(1, n_packed)
    else:
        w_p = w
        b_p = b.reshape(1, n_packed)

    # Tile the packed-row axis under a VMEM budget; guarantee >= 2 tiles for
    # large problems so both v7x TensorCores get work.
    bytes_per_row = 4 * (k_packed + n_packed)
    budget_rows = max(8, vmem_budget_bytes // (2 * bytes_per_row))
    if q_rows <= single_tile_rows and q_rows <= budget_rows:
        tq = q_rows                        # one step, no pipeline priming/drain
    else:
        tq = min(budget_rows, max_tile_rows, -(-q_rows // 2))
        tq = max(8, (tq // 8) * 8)         # (8, 128) block-shape rule
    n_tiles = pl.cdiv(q_rows, tq)

    cost = pl.CostEstimate(
        flops=2 * q_rows * k_packed * n_packed,
        transcendentals=0,
        bytes_accessed=4 * (q_rows * k_packed + k_packed * n_packed
                            + n_packed + q_rows * n_packed),
    )

    out = pl.pallas_call(
        _encoder_kernel,
        out_shape=jax.ShapeDtypeStruct((q_rows, n_packed), dtype),
        grid_spec=pltpu.PrefetchScalarGridSpec(
            num_scalar_prefetch=0,
            grid=(n_tiles,),
            in_specs=[
                pl.BlockSpec((tq, k_packed), lambda i: (i, 0)),
                pl.BlockSpec((k_packed, n_packed), lambda i: (0, 0)),
                pl.BlockSpec((1, n_packed), lambda i: (0, 0)),
            ],
            out_specs=pl.BlockSpec((tq, n_packed), lambda i: (i, 0)),
        ),
        compiler_params=pltpu.CompilerParams(
            dimension_semantics=("parallel",),
            vmem_limit_bytes=32 * 1024 * 1024,
        ),
        cost_estimate=cost,
    )(x_rows, w_p, b_p)

    # (q_rows, pack*E) -> (B, H*W, E): row-major contiguous, i.e. free.
    return out.reshape(B, HW, E)


if __name__ == "__main__":
    # Small shapes consistent with the module: batch=2, channels (input_dim)=4,
    # spatial 16x16, embedding_dim=32.
    B, C, H, W = 2, 4, 16, 16
    input_dim, embedding_dim = C, 32

    key = jax.random.PRNGKey(0)
    k_x, k_w, k_b = jax.random.split(key, 3)

    x = jax.random.normal(k_x, (B, C, H, W), dtype=jnp.float32)

    # nn.Linear-style init U[-1/sqrt(in), 1/sqrt(in)], deterministic.
    bound = 1.0 / jnp.sqrt(jnp.float32(input_dim))
    w = jax.random.uniform(
        k_w, (input_dim, embedding_dim), dtype=jnp.float32, minval=-bound, maxval=bound
    )
    b = jax.random.uniform(
        k_b, (embedding_dim,), dtype=jnp.float32, minval=-bound, maxval=bound
    )

    out = cnn_encoder_forward(x, w, b)
    out = jax.block_until_ready(out)

    # Pure-JAX reference (mirrors the torch permute/view/linear/relu).
    x_nhwc = jnp.transpose(x, (0, 2, 3, 1)).reshape(B, H * W, C)
    ref = jnp.maximum(x_nhwc @ w + b, 0.0)
    assert out.shape == (B, H * W, embedding_dim)
    assert jnp.allclose(out, ref, atol=1e-5, rtol=1e-5)

    print("KERNEL_OK")
</pallas_src>

<mosaic_0001>
module attributes {stable_mosaic.version = 11 : i64} {
  func.func @_encoder_kernel(%arg0: i32, %arg1: memref<128x16xf32, #tpu.memory_space<vmem>>, %arg2: memref<16x128xf32, #tpu.memory_space<vmem>>, %arg3: memref<1x128xf32, #tpu.memory_space<vmem>>, %arg4: memref<128x128xf32, #tpu.memory_space<vmem>>) attributes {dimension_semantics = [#tpu.dimension_semantics<parallel>], iteration_bounds = array<i64: 1>, scalar_prefetch = 0 : i64, scratch_operands = 0 : i64, tpu.core_type = #tpu.core_type<tc>, window_params = [{transform_indices = @transform_0, window_bounds = array<i64: 128, 16>}, {pipeline_mode = #tpu.pipeline_mode<synchronous>, transform_indices = @transform_1, window_bounds = array<i64: 16, 128>}, {pipeline_mode = #tpu.pipeline_mode<synchronous>, transform_indices = @transform_2, window_bounds = array<i64: 1, 128>}, {transform_indices = @transform_3, window_bounds = array<i64: 128, 128>}]} {
    %c0 = arith.constant 0 : index
    %c0_0 = arith.constant 0 : index
    %0 = vector.load %arg1[%c0, %c0_0] : memref<128x16xf32, #tpu.memory_space<vmem>>, vector<128x16xf32>
    %c0_1 = arith.constant 0 : index
    %c0_2 = arith.constant 0 : index
    %1 = vector.load %arg2[%c0_1, %c0_2] : memref<16x128xf32, #tpu.memory_space<vmem>>, vector<16x128xf32>
    %cst = arith.constant dense<0.000000e+00> : vector<128x128xf32>
    %2 = tpu.matmul %0, %1, %cst {dimension_numbers = #tpu.dot_dimension_numbers<[1], [0], [0], [1], [0, 0, 1, 1], [], []>} : vector<128x16xf32>, vector<16x128xf32>, vector<128x128xf32> -> vector<128x128xf32>
    %c0_3 = arith.constant 0 : index
    %c0_4 = arith.constant 0 : index
    %3 = vector.load %arg3[%c0_3, %c0_4] : memref<1x128xf32, #tpu.memory_space<vmem>>, vector<1x128xf32>
    %4 = vector.broadcast %3 : vector<1x128xf32> to vector<128x128xf32>
    %5 = arith.addf %2, %4 : vector<128x128xf32>
    %cst_5 = arith.constant 0.000000e+00 : f32
    %6 = vector.broadcast %cst_5 : f32 to vector<128x128xf32>
    %7 = arith.maximumf %5, %6 : vector<128x128xf32>
    %c0_6 = arith.constant 0 : index
    %c0_7 = arith.constant 0 : index
    %8 = vector.load %arg4[%c0_6, %c0_7] : memref<128x128xf32, #tpu.memory_space<vmem>>, vector<128x128xf32>
    tpu.vector_store %arg4[%c0_6, %c0_7], %7 {strides = array<i32>} : memref<128x128xf32, #tpu.memory_space<vmem>>, vector<128x128xf32>,
    return
  }
  func.func @transform_0(%arg0: i32) -> (i32, i32) {
    %c0_i32 = arith.constant 0 : i32
    %c0_i32_0 = arith.constant 0 : i32
    return %arg0, %c0_i32 : i32, i32
  }
  func.func @transform_1(%arg0: i32) -> (i32, i32) {
    %c0_i32 = arith.constant 0 : i32
    %c0_i32_0 = arith.constant 0 : i32
    %c0_i32_1 = arith.constant 0 : i32
    return %c0_i32, %c0_i32_0 : i32, i32
  }
  func.func @transform_2(%arg0: i32) -> (i32, i32) {
    %c0_i32 = arith.constant 0 : i32
    %c0_i32_0 = arith.constant 0 : i32
    %c0_i32_1 = arith.constant 0 : i32
    return %c0_i32, %c0_i32_0 : i32, i32
  }
  func.func @transform_3(%arg0: i32) -> (i32, i32) {
    %c0_i32 = arith.constant 0 : i32
    %c0_i32_0 = arith.constant 0 : i32
    return %arg0, %c0_i32 : i32, i32
  }
}

</mosaic_0001>

<bundles_post_ra>
// kernel: tpu_custom_call.1
= control target key start
LH: loop header
LB: loop body
LE: loop exit
PB: predicated region body
PF: predicated region fallthrough
CT: control target
= control target key end

     0   :  { %vm40_vm0 = vcmask 130048   ;;  %s486_s0 = inlined_call_operand.vmem [shape: f32[128,16], index: 0, kind: input, shape index: {}]   ;;  %s487_s1 = inlined_call_operand.vmem [shape: f32[16,128], index: 1, kind: input, shape index: {}]   ;;  %s488_s2 = inlined_call_operand.vmem [shape: f32[1,128], index: 2, kind: input, shape index: {}]   ;;  %s489_s3 = inlined_call_operand.hbm [shape: f32[128,128], index: 3, kind: output, shape index: {}]  }
   0x1   :  { %v31_v0 = vld [vmem:[%s487_s1] sm:$0xff]  ;;  %v32_v1 = vld [vmem:[%s487_s1 + $0x8] sm:$0xff]  ;;  %v17_v7 = vld [vmem:[%s486_s0 + $0x10] sm:$0xff] }
   0x2   :  { %v15_v2 = vld [vmem:[%s486_s0] sm:$0xff]  ;;  %v345_v3 = vpack.c.bf16 %v32_v1, %v31_v0  ;;  %v16_v5 = vld [vmem:[%s486_s0 + $0x8] sm:$0xff]  ;;  %v25_v8 = vld [vmem:[%s486_s0 + $0x50] sm:$0xff] }
   0x3   :  { %321 = vmatprep.mubr.msk.f32.mxu0 %vm40_vm0, %v15_v2  ;;  %v23_v4 = vld [vmem:[%s486_s0 + $0x40] sm:$0xff]  ;;  %v24_v6 = vld [vmem:[%s486_s0 + $0x48] sm:$0xff] }
   0x4   :  { %333 = vmatprep.mubr.msk.f32.mxu1 %vm40_vm0, %v23_v4  ;;  %346 = vmatprep.subr.bf16.mxu0 %v345_v3 }
   0x5   :  { %349 = vmatprep.subr.bf16.mxu1 %v345_v3  ;;  %348 = vmatpush3.bf16.msra.mxu0 %v345_v3 }
   0x6   :  { %350 = vmatpush3.bf16.msra.mxu1 %v345_v3 }
   0x7   :  { %8 = vsyncpa [#allocation3], 0  ;;  %v18_v9 = vld [vmem:[%s486_s0 + $0x18] sm:$0xff]  ;;  %v19_v11 = vld [vmem:[%s486_s0 + $0x20] sm:$0xff] }
   0x8   :  { %322 = vmatmul.mubr.msk.f32.vlgmr.msra.gmra.mrb[0].mxu0 %vm40_vm0, %v16_v5  ;;  %v26_v10 = vld [vmem:[%s486_s0 + $0x58] sm:$0xff]  ;;  %v27_v12 = vld [vmem:[%s486_s0 + $0x60] sm:$0xff]  ;;  %v20_v13 = vld [vmem:[%s486_s0 + $0x28] sm:$0xff] }
   0x9   :  { %334 = vmatmul.mubr.msk.f32.vlgmr.msra.gmra.mrb[0].mxu1 %vm40_vm0, %v24_v6  ;;  %324 = vmatprep.mubr.msk.f32.mxu0 %vm40_vm0, %v17_v7  ;;  %v28_v14 = vld [vmem:[%s486_s0 + $0x68] sm:$0xff]  ;;  %v21_v15 = vld [vmem:[%s486_s0 + $0x30] sm:$0xff]  ;;  %v22_v17 = vld [vmem:[%s486_s0 + $0x38] sm:$0xff] }
   0xa   :  { %336 = vmatprep.mubr.msk.f32.mxu1 %vm40_vm0, %v25_v8  ;;  %v29_v16 = vld [vmem:[%s486_s0 + $0x70] sm:$0xff]  ;;  %v30_v18 = vld [vmem:[%s486_s0 + $0x78] sm:$0xff]  ;;  %v282_v19 = vld [vmem:[%s488_s2] ss:$0 sm:$0xff]  ;;  %s378_s0 = smov [#allocation2]  }
   0xb   :  { %s271_s2 = sshll.u32 %s378_s0, 4  ;;  %s272_s2 = int_to_ptr.vmem [resolvable:$true] %s271_s2 }
   0xc   :  { %325 = vmatmul.mubr.msk.f32.gmra.mrb[2].mxu0 %vm40_vm0, %v18_v9  ;;  %s354_s21 = scalar_lea.vmem %s272_s2, 2048  ;;  %p359_p1 = scmp.lt.s32.totalorder %s272_s2, %s272_s2 }
   0xd   :  { %337 = vmatmul.mubr.msk.f32.gmra.mrb[2].mxu1 %vm40_vm0, %v26_v10  ;;  %327 = vmatprep.mubr.msk.f32.mxu0 %vm40_vm0, %v19_v11  ;;  %p355_p0 = scmp.ne.s32.totalorder %s272_s2, %s354_s21  ;;  %p360_p2 = scmp.lt.s32.totalorder %s354_s21, %s354_s21 }
   0xe   :  { %339 = vmatprep.mubr.msk.f32.mxu1 %vm40_vm0, %v27_v12 }
   0xf   :  { %p361_p3 = por %p360_p2, %p359_p1 }
  0x10   :  { %328 = vmatmul.mubr.msk.f32.gmra.mrb[4].mxu0 %vm40_vm0, %v20_v13 }
  0x11   :  { %340 = vmatmul.mubr.msk.f32.gmra.mrb[4].mxu1 %vm40_vm0, %v28_v14  ;;  %330 = vmatprep.mubr.msk.f32.mxu0 %vm40_vm0, %v21_v15  ;;  %p362_p4 = pnand %p361_p3, %p355_p0 }
  0x12   :  { %342 = vmatprep.mubr.msk.f32.mxu1 %vm40_vm0, %v29_v16 }
  0x14   :  { %331 = vmatmul.mubr.msk.f32.gmra.mrb[6].mxu0 %vm40_vm0, %v22_v17 }
  0x15   :  { %343 = vmatmul.mubr.msk.f32.gmra.mrb[6].mxu1 %vm40_vm0, %v30_v18 }
  0xdb   :  { %v323_v20 = vpop.f32.mrb[0].mxu0 }
  0xdc   :  { %v335_v21 = vpop.f32.mrb[0].mxu1  ;;  %v161_v22 = vadd.f32 %v323_v20, %v282_v19  ;;  %v155_v24 = vpop.f32.mrb[1].mxu0 }
  0xdd   :  { %v201_v23 = vadd.f32 %v335_v21, %v282_v19  ;;  %v195_v25 = vpop.f32.mrb[1].mxu1  ;;  %v156_v26 = vadd.f32 %v282_v19, %v155_v24 }
  0xde   :  { %v196_v27 = vadd.f32 %v282_v19, %v195_v25  ;;  %v235_v28 = vmax.f32 %v161_v22, 0.0 }
  0xdf   :  { %v243_v29 = vmax.f32 %v201_v23, 0.0  ;;  %v234_v30 = vmax.f32 %v156_v26, 0.0  ;;  %v326_v32 = vpop.f32.mrb[2].mxu0 }
  0xe0   :  { %v242_v31 = vmax.f32 %v196_v27, 0.0  ;;  %v338_v33 = vpop.f32.mrb[2].mxu1  ;;  %251 = vst [vmem:[#allocation2 + $0x8] sm:$0xff] %v235_v28  ;;  %v171_v34 = vadd.f32 %v326_v32, %v282_v19  ;;  %v165_v36 = vpop.f32.mrb[3].mxu0 }
  0xe1   :  { %259 = vst [vmem:[#allocation2 + $0x48] sm:$0xff] %v243_v29  ;;  %v211_v35 = vadd.f32 %v338_v33, %v282_v19  ;;  %v205_v37 = vpop.f32.mrb[3].mxu1  ;;  %250 = vst [vmem:[#allocation2] sm:$0xff] %v234_v30  ;;  %v166_v38 = vadd.f32 %v282_v19, %v165_v36 }
  0xe2   :  { %258 = vst [vmem:[#allocation2 + $0x40] sm:$0xff] %v242_v31  ;;  %v206_v39 = vadd.f32 %v282_v19, %v205_v37  ;;  %v237_v40 = vmax.f32 %v171_v34, 0.0 }
  0xe3   :  { %v245_v41 = vmax.f32 %v211_v35, 0.0  ;;  %v236_v42 = vmax.f32 %v166_v38, 0.0  ;;  %v329_v44 = vpop.f32.mrb[4].mxu0 }
  0xe4   :  { %v244_v43 = vmax.f32 %v206_v39, 0.0  ;;  %v341_v45 = vpop.f32.mrb[4].mxu1  ;;  %253 = vst [vmem:[#allocation2 + $0x18] sm:$0xff] %v237_v40  ;;  %v181_v46 = vadd.f32 %v329_v44, %v282_v19  ;;  %v175_v48 = vpop.f32.mrb[5].mxu0 }
  0xe5   :  { %261 = vst [vmem:[#allocation2 + $0x58] sm:$0xff] %v245_v41  ;;  %v221_v47 = vadd.f32 %v341_v45, %v282_v19  ;;  %v215_v49 = vpop.f32.mrb[5].mxu1  ;;  %252 = vst [vmem:[#allocation2 + $0x10] sm:$0xff] %v236_v42  ;;  %v176_v50 = vadd.f32 %v282_v19, %v175_v48 }
  0xe6   :  { %260 = vst [vmem:[#allocation2 + $0x50] sm:$0xff] %v244_v43  ;;  %v216_v51 = vadd.f32 %v282_v19, %v215_v49  ;;  %v239_v52 = vmax.f32 %v181_v46, 0.0 }
  0xe7   :  { %v247_v53 = vmax.f32 %v221_v47, 0.0  ;;  %v238_v54 = vmax.f32 %v176_v50, 0.0  ;;  %v332_v56 = vpop.f32.mrb[6].mxu0 }
  0xe8   :  { %v246_v55 = vmax.f32 %v216_v51, 0.0  ;;  %v344_v57 = vpop.f32.mrb[6].mxu1  ;;  %255 = vst [vmem:[#allocation2 + $0x28] sm:$0xff] %v239_v52  ;;  %v191_v58 = vadd.f32 %v332_v56, %v282_v19  ;;  %v185_v60 = vpop.f32.mrb[7].mxu0 }
  0xe9   :  { %263 = vst [vmem:[#allocation2 + $0x68] sm:$0xff] %v247_v53  ;;  %v231_v59 = vadd.f32 %v344_v57, %v282_v19  ;;  %v225_v61 = vpop.f32.mrb[7].mxu1  ;;  %254 = vst [vmem:[#allocation2 + $0x20] sm:$0xff] %v238_v54  ;;  %v186_v62 = vadd.f32 %v282_v19, %v185_v60 }
  0xea   :  { %262 = vst [vmem:[#allocation2 + $0x60] sm:$0xff] %v246_v55  ;;  %v226_v63 = vadd.f32 %v282_v19, %v225_v61  ;;  %v241_v0 = vmax.f32 %v191_v58, 0.0 }
  0xeb   :  { %v249_v1 = vmax.f32 %v231_v59, 0.0  ;;  %v240_v2 = vmax.f32 %v186_v62, 0.0 }
  0xec   :  { %v248_v3 = vmax.f32 %v226_v63, 0.0  ;;  %257 = vst [vmem:[#allocation2 + $0x38] sm:$0xff] %v241_v0 }
  0xed   :  { %265 = vst [vmem:[#allocation2 + $0x78] sm:$0xff] %v249_v1  ;;  %256 = vst [vmem:[#allocation2 + $0x30] sm:$0xff] %v240_v2 }
  0xee   :  { %264 = vst [vmem:[#allocation2 + $0x70] sm:$0xff] %v248_v3 }
  0xef   :  { %365 = shalt.err (!%p362_p4)
}
  0xf0   :  { %s366_s24 = scalar_lea.hbm %s489_s3, 2048 }
  0xf1   :  { %p367_p5 = scmp.ne.s32.totalorder %s489_s3, %s366_s24  ;;  %p370_p6 = scmp.lt.u32.totalorder %s366_s24, %s489_s3 }
  0xf3   :  { %p372_p7 = pnand %p370_p6, %p367_p5 }
  0xf5   :  { %375 = shalt.err (!%p372_p7)
}
  0xf6   :  { %s379_s29 = smov 128   ;;  %s380_s30 = smov 8  }
  0xf7   :  { %277 = dma.vmem_to_hbm [thread:$0]  %s272_s2, 2048, %s489_s3, [#allocation3], %s379_s29, %s379_s29, %s380_s30  }
  0xf8   :  { %376 = dma.done.wait [#allocation3], 2048  }
  0xf9   :  { %377 = vsyncadd [#allocation3], 4294965248 }
  0xfa   :  { %281 = vsyncpa [#allocation3], 1 }

</bundles_post_ra>
